<compile_context>
chip_gen: v6e
topology: v6e:2x2x1
jax: 0.10.0
libtpu: 0.0.40
codegen_flags: <defaults>
</compile_context>

<pallas_src>
import functools

import jax
import jax.numpy as jnp
from jax.experimental import pallas as pl
from jax.experimental.pallas import tpu as pltpu


HIDDEN = 1024
_TK = 2048                       # K (gene_num) tile for the streamed w1 path
_TB_CAP = 256                    # max batch tile (fills 256x256 MXU rows)
_RESIDENT_W1_BYTES = 12 << 20    # keep w1 as a single block (fetched once) below this
_NEG_BIG = -1e30                 # plain Python float (NOT a jnp constant -> no capture)


def _round_up(n, m):
    return ((n + m - 1) // m) * m


# ----------------------------------------------------------------------------
# Fused kernel
# ----------------------------------------------------------------------------
def _disc_kernel(x_ref, w1_ref, b1_ref, wh_ref, bh_ref, out_ref, acc_ref,
                 *, n_adv, n_aux, n_cls):
    k = pl.program_id(1)

    # fcnLayer GEMM: x_tile @ w1_tile in f32 (MXU, bf16 operands).
    prod = jnp.dot(x_ref[...], w1_ref[...], preferred_element_type=jnp.float32)

    @pl.when(k == 0)
    def _first():
        acc_ref[...] = prod            # write directly: no zero-init + RMW

    @pl.when(k != 0)
    def _accum():
        acc_ref[...] += prod

    @pl.when(k == pl.num_programs(1) - 1)
    def _finalize():
        z1 = acc_ref[...] + b1_ref[...]                       # [tb, 1024]
        h = jnp.where(z1 >= 0.0, z1, 0.1 * z1)                # LeakyReLU(0.1)
        # Dropout(0.25) is identity in eval mode.

        # All three heads fused into a single lane-dense matmul.
        z = jnp.dot(h.astype(wh_ref.dtype), wh_ref[...],
                    preferred_element_type=jnp.float32) + bh_ref[...]  # [tb, HP]

        tb, hp = out_ref.shape
        col = jax.lax.broadcasted_iota(jnp.int32, (tb, hp), 1)

        # advLayer: numerically-stable sigmoid, kept only on column 0.
        ez = jnp.exp(-jnp.abs(z))
        sig = jnp.where(z >= 0.0, 1.0, ez) * pl.reciprocal(1.0 + ez, approx=True)
        out = jnp.where(col < n_adv, sig, 0.0)

        def masked_softmax(lo, hi):
            m = jnp.logical_and(col >= lo, col < hi)
            zc = jnp.where(m, z, _NEG_BIG)
            zmax = jnp.max(zc, axis=-1, keepdims=True)
            e = jnp.exp(zc - zmax)                  # masked-out lanes underflow to 0
            denom = jnp.sum(e, axis=-1, keepdims=True)
            return e * pl.reciprocal(denom, approx=True)

        # Static (Python-level) guards protect against empty segments
        # (e.g. subtype_num == 0 -> n_cls == 0).
        segs = ((n_adv, n_adv + n_aux),                        # auxLayer
                (n_adv + n_aux, n_adv + n_aux + n_cls))        # clsLayer
        for lo, hi in segs:
            if hi > lo:
                out = out + masked_softmax(lo, hi)

        out_ref[...] = out.astype(out_ref.dtype)


# ----------------------------------------------------------------------------
# Parameters: raw (torch-like, eval mode) and folded/packed for the kernel
# ----------------------------------------------------------------------------
def init_raw_params(key, gene_num, subtype_num, hidden=HIDDEN):
    ks = jax.random.split(key, 24)

    def lin(kw, kb, fin, fout):
        w = jax.random.normal(kw, (fin, fout), jnp.float32) * 0.02   # == torch W.T
        b = jax.random.normal(kb, (fout,), jnp.float32) * 0.01
        return w, b

    def bn(kg, kb, km, kv, f):
        return dict(
            gamma=1.0 + 0.1 * jax.random.normal(kg, (f,), jnp.float32),
            beta=0.1 * jax.random.normal(kb, (f,), jnp.float32),
            mean=0.1 * jax.random.normal(km, (f,), jnp.float32),
            var=1.0 + 0.1 * jax.random.uniform(kv, (f,), jnp.float32),
        )

    p = {}
    p["bn0"] = bn(*ks[0:4], gene_num)
    p["w1"], p["b1"] = lin(ks[4], ks[5], gene_num, hidden)
    p["bn_adv"] = bn(*ks[6:10], hidden)
    p["w_adv"], p["b_adv"] = lin(ks[10], ks[11], hidden, 1)
    p["bn_aux"] = bn(*ks[12:16], hidden)
    p["w_aux"], p["b_aux"] = lin(ks[16], ks[17], hidden, subtype_num + 1)
    p["bn_cls"] = bn(*ks[18:22], hidden)
    p["w_cls"], p["b_cls"] = lin(ks[22], ks[23], hidden, subtype_num)
    return p


def _fold_bn_linear(bn, w, b, eps=1e-5):
    scale = bn["gamma"] / jnp.sqrt(bn["var"] + eps)   # [fin]
    shift = bn["beta"] - bn["mean"] * scale           # [fin]
    return w * scale[:, None], b + shift @ w


def fold_and_pack(raw, subtype_num, hidden=HIDDEN):
    """Fold eval-mode BN into the Linears, concat+pad head weights, cast to bf16."""
    n_adv, n_aux, n_cls = 1, subtype_num + 1, subtype_num
    n_heads = n_adv + n_aux + n_cls
    hp = _round_up(n_heads, 128)

    w1, b1 = _fold_bn_linear(raw["bn0"], raw["w1"], raw["b1"])
    wa, ba = _fold_bn_linear(raw["bn_adv"], raw["w_adv"], raw["b_adv"])
    wx, bx = _fold_bn_linear(raw["bn_aux"], raw["w_aux"], raw["b_aux"])
    wc, bc = _fold_bn_linear(raw["bn_cls"], raw["w_cls"], raw["b_cls"])

    wh = jnp.pad(jnp.concatenate([wa, wx, wc], axis=1), ((0, 0), (0, hp - n_heads)))
    bh = jnp.pad(jnp.concatenate([ba, bx, bc], axis=0), ((0, hp - n_heads),))

    # Pad the K (gene) axis of w1 so it tiles evenly (done once, offline).
    K = w1.shape[0]
    if K * hidden * 2 <= _RESIDENT_W1_BYTES or K <= _TK:
        Kp = K                               # single K block (resident in VMEM)
    else:
        Kp = _round_up(K, _TK)               # streamed in _TK tiles
    if Kp != K:
        w1 = jnp.pad(w1, ((0, Kp - K), (0, 0)))

    return dict(
        w1=w1.astype(jnp.bfloat16),
        b1=b1.reshape(1, hidden).astype(jnp.float32),
        wh=wh.astype(jnp.bfloat16),
        bh=bh.reshape(1, hp).astype(jnp.float32),
    )


def _choose_batch_tiling(B):
    """Batch tile: multiple of 16, capped at _TB_CAP, >=2 tiles once B>32 (megacore)."""
    Bp = _round_up(max(B, 1), 16)
    if Bp <= 32:
        return Bp, Bp
    tb = min(_TB_CAP, _round_up((Bp + 1) // 2, 16))
    Bp = _round_up(Bp, tb)
    return tb, Bp


# ----------------------------------------------------------------------------
# Forward
# ----------------------------------------------------------------------------
@functools.partial(jax.jit, static_argnames=("subtype_num",))
def discriminator_forward(packed, trns, subtype_num):
    n_adv, n_aux, n_cls = 1, subtype_num + 1, subtype_num
    hidden = packed["b1"].shape[1]
    hp = packed["bh"].shape[1]

    B, K = trns.shape
    Kp = packed["w1"].shape[0]
    x = trns.astype(jnp.bfloat16)
    if Kp != K:
        x = jnp.pad(x, ((0, 0), (0, Kp - K)))

    # K tiling: single resident block when small enough, else stream in _TK tiles.
    tk = Kp if (Kp <= _TK or Kp * hidden * 2 <= _RESIDENT_W1_BYTES) else _TK
    nk = Kp // tk

    # Batch tiling (multiple of 16, >=2 tiles for megacore when B > 32).
    tb, Bp = _choose_batch_tiling(B)
    if Bp != B:
        x = jnp.pad(x, ((0, Bp - B), (0, 0)))
    nb = Bp // tb

    kernel = functools.partial(_disc_kernel, n_adv=n_adv, n_aux=n_aux, n_cls=n_cls)

    out = pl.pallas_call(
        kernel,
        out_shape=jax.ShapeDtypeStruct((Bp, hp), jnp.float32),
        grid_spec=pltpu.PrefetchScalarGridSpec(
            num_scalar_prefetch=0,
            grid=(nb, nk),
            in_specs=[
                pl.BlockSpec((tb, tk), lambda b, k: (b, k)),        # x (bf16)
                pl.BlockSpec((tk, hidden), lambda b, k: (k, 0)),    # w1 (bf16)
                pl.BlockSpec((1, hidden), lambda b, k: (0, 0)),     # b1 (f32)
                pl.BlockSpec((hidden, hp), lambda b, k: (0, 0)),    # wh (bf16)
                pl.BlockSpec((1, hp), lambda b, k: (0, 0)),         # bh (f32)
            ],
            out_specs=pl.BlockSpec((tb, hp), lambda b, k: (b, 0)),
            scratch_shapes=[pltpu.VMEM((tb, hidden), jnp.float32)],
        ),
        compiler_params=pltpu.CompilerParams(
            dimension_semantics=("parallel", "arbitrary"),
            vmem_limit_bytes=48 << 20),
    )(x, packed["w1"], packed["b1"], packed["wh"], packed["bh"])

    validity = out[:B, :n_adv]
    label = out[:B, n_adv:n_adv + n_aux]
    cls = out[:B, n_adv + n_aux:n_adv + n_aux + n_cls]
    return validity, label, cls


# ----------------------------------------------------------------------------
# Pure-JAX reference (unfused, unfolded, f32) for a loose numerical check
# ----------------------------------------------------------------------------
def reference_forward(raw, trns, eps=1e-5):
    def bn(x, p):
        return (x - p["mean"]) / jnp.sqrt(p["var"] + eps) * p["gamma"] + p["beta"]

    h = bn(trns, raw["bn0"]) @ raw["w1"] + raw["b1"]
    h = jnp.where(h >= 0.0, h, 0.1 * h)
    validity = jax.nn.sigmoid(bn(h, raw["bn_adv"]) @ raw["w_adv"] + raw["b_adv"])
    label = jax.nn.softmax(bn(h, raw["bn_aux"]) @ raw["w_aux"] + raw["b_aux"], axis=1)
    cls = jax.nn.softmax(bn(h, raw["bn_cls"]) @ raw["w_cls"] + raw["b_cls"], axis=1)
    return validity, label, cls


if __name__ == "__main__":
    gene_num = 64
    subtype_num = 5
    batch = 8

    key = jax.random.PRNGKey(0)
    k_params, k_x = jax.random.split(key)
    raw = init_raw_params(k_params, gene_num, subtype_num)
    packed = fold_and_pack(raw, subtype_num)
    trns = jax.random.normal(k_x, (batch, gene_num), jnp.float32)

    validity, label, cls = discriminator_forward(packed, trns, subtype_num=subtype_num)
    jax.block_until_ready((validity, label, cls))

    assert validity.shape == (batch, 1)
    assert label.shape == (batch, subtype_num + 1)
    assert cls.shape == (batch, subtype_num)
    # softmax rows must sum to ~1 (approx reciprocal -> loose tolerance)
    assert jnp.allclose(jnp.sum(label, axis=1), 1.0, atol=1e-2)
    assert jnp.allclose(jnp.sum(cls, axis=1), 1.0, atol=1e-2)

    # loose check vs pure-JAX f32 reference (bf16 weights + approx reciprocal)
    v_ref, l_ref, c_ref = reference_forward(raw, trns)
    assert jnp.allclose(validity, v_ref, atol=2e-2)
    assert jnp.allclose(label, l_ref, atol=2e-2)
    assert jnp.allclose(cls, c_ref, atol=2e-2)

    print("KERNEL_OK")
</pallas_src>

<mosaic_0001>
module attributes {stable_mosaic.version = 11 : i64} {
  func.func @_disc_kernel(%arg0: i32, %arg1: i32, %arg2: memref<16x64xbf16, #tpu.memory_space<vmem>>, %arg3: memref<64x1024xbf16, #tpu.memory_space<vmem>>, %arg4: memref<1x1024xf32, #tpu.memory_space<vmem>>, %arg5: memref<1024x128xbf16, #tpu.memory_space<vmem>>, %arg6: memref<1x128xf32, #tpu.memory_space<vmem>>, %arg7: memref<16x128xf32, #tpu.memory_space<vmem>>, %arg8: memref<16x1024xf32, #tpu.memory_space<vmem>>) attributes {dimension_semantics = [#tpu.dimension_semantics<parallel>, #tpu.dimension_semantics<arbitrary>], iteration_bounds = array<i64: 1, 1>, scalar_prefetch = 0 : i64, scratch_operands = 1 : i64, tpu.core_type = #tpu.core_type<tc>, window_params = [{transform_indices = @transform_0, window_bounds = array<i64: 16, 64>}, {transform_indices = @transform_1, window_bounds = array<i64: 64, 1024>}, {pipeline_mode = #tpu.pipeline_mode<synchronous>, transform_indices = @transform_2, window_bounds = array<i64: 1, 1024>}, {pipeline_mode = #tpu.pipeline_mode<synchronous>, transform_indices = @transform_3, window_bounds = array<i64: 1024, 128>}, {pipeline_mode = #tpu.pipeline_mode<synchronous>, transform_indices = @transform_4, window_bounds = array<i64: 1, 128>}, {transform_indices = @transform_5, window_bounds = array<i64: 16, 128>}]} {
    %c0 = arith.constant 0 : index
    %c0_0 = arith.constant 0 : index
    %0 = vector.load %arg2[%c0, %c0_0] : memref<16x64xbf16, #tpu.memory_space<vmem>>, vector<16x64xbf16>
    %c0_1 = arith.constant 0 : index
    %c0_2 = arith.constant 0 : index
    %1 = vector.load %arg3[%c0_1, %c0_2] : memref<64x1024xbf16, #tpu.memory_space<vmem>>, vector<64x1024xbf16>
    %cst = arith.constant dense<0.000000e+00> : vector<16x1024xf32>
    %2 = tpu.matmul %0, %1, %cst {dimension_numbers = #tpu.dot_dimension_numbers<[1], [0], [0], [1], [0, 0, 1, 1], [], []>} : vector<16x64xbf16>, vector<64x1024xbf16>, vector<16x1024xf32> -> vector<16x1024xf32>
    %c0_i32 = arith.constant 0 : i32
    %3 = arith.cmpi eq, %arg1, %c0_i32 : i32
    %4 = arith.extui %3 : i1 to i32
    %c0_i32_3 = arith.constant 0 : i32
    %5 = arith.cmpi ne, %4, %c0_i32_3 : i32
    scf.if %5 {
      %c0_8 = arith.constant 0 : index
      %c0_9 = arith.constant 0 : index
      %12 = vector.load %arg8[%c0_8, %c0_9] : memref<16x1024xf32, #tpu.memory_space<vmem>>, vector<16x1024xf32>
      tpu.vector_store %arg8[%c0_8, %c0_9], %2 {strides = array<i32>} : memref<16x1024xf32, #tpu.memory_space<vmem>>, vector<16x1024xf32>,
    } else {
    }
    %c0_i32_4 = arith.constant 0 : i32
    %6 = arith.cmpi ne, %arg1, %c0_i32_4 : i32
    %7 = arith.extui %6 : i1 to i32
    %c0_i32_5 = arith.constant 0 : i32
    %8 = arith.cmpi ne, %7, %c0_i32_5 : i32
    scf.if %8 {
      %c0_8 = arith.constant 0 : index
      %c0_9 = arith.constant 0 : index
      %12 = vector.load %arg8[%c0_8, %c0_9] : memref<16x1024xf32, #tpu.memory_space<vmem>>, vector<16x1024xf32>
      %13 = arith.addf %12, %2 : vector<16x1024xf32>
      %c0_10 = arith.constant 0 : index
      %c0_11 = arith.constant 0 : index
      %14 = vector.load %arg8[%c0_10, %c0_11] : memref<16x1024xf32, #tpu.memory_space<vmem>>, vector<16x1024xf32>
      tpu.vector_store %arg8[%c0_10, %c0_11], %13 {strides = array<i32>} : memref<16x1024xf32, #tpu.memory_space<vmem>>, vector<16x1024xf32>,
    } else {
    }
    %c0_i32_6 = arith.constant 0 : i32
    %9 = arith.cmpi eq, %arg1, %c0_i32_6 : i32
    %10 = arith.extui %9 : i1 to i32
    %c0_i32_7 = arith.constant 0 : i32
    %11 = arith.cmpi ne, %10, %c0_i32_7 : i32
    scf.if %11 {
      %c0_8 = arith.constant 0 : index
      %c0_9 = arith.constant 0 : index
      %12 = vector.load %arg8[%c0_8, %c0_9] : memref<16x1024xf32, #tpu.memory_space<vmem>>, vector<16x1024xf32>
      %c0_10 = arith.constant 0 : index
      %c0_11 = arith.constant 0 : index
      %13 = vector.load %arg4[%c0_10, %c0_11] : memref<1x1024xf32, #tpu.memory_space<vmem>>, vector<1x1024xf32>
      %14 = vector.broadcast %13 : vector<1x1024xf32> to vector<16x1024xf32>
      %15 = arith.addf %12, %14 : vector<16x1024xf32>
      %cst_12 = arith.constant 0.000000e+00 : f32
      %16 = vector.broadcast %cst_12 : f32 to vector<16x1024xf32>
      %17 = arith.cmpf oge, %15, %16 : vector<16x1024xf32>
      %cst_13 = arith.constant 1.000000e-01 : f32
      %18 = vector.broadcast %cst_13 : f32 to vector<16x1024xf32>
      %19 = arith.mulf %18, %15 : vector<16x1024xf32>
      %20 = arith.select %17, %15, %19 : vector<16x1024xi1>, vector<16x1024xf32>
      %21 = arith.truncf %20 : vector<16x1024xf32> to vector<16x1024xbf16>
      %c0_14 = arith.constant 0 : index
      %c0_15 = arith.constant 0 : index
      %22 = vector.load %arg5[%c0_14, %c0_15] : memref<1024x128xbf16, #tpu.memory_space<vmem>>, vector<1024x128xbf16>
      %cst_16 = arith.constant dense<0.000000e+00> : vector<16x128xf32>
      %23 = tpu.matmul %21, %22, %cst_16 {dimension_numbers = #tpu.dot_dimension_numbers<[1], [0], [0], [1], [0, 0, 1, 1], [], []>} : vector<16x1024xbf16>, vector<1024x128xbf16>, vector<16x128xf32> -> vector<16x128xf32>
      %c0_17 = arith.constant 0 : index
      %c0_18 = arith.constant 0 : index
      %24 = vector.load %arg6[%c0_17, %c0_18] : memref<1x128xf32, #tpu.memory_space<vmem>>, vector<1x128xf32>
      %25 = vector.broadcast %24 : vector<1x128xf32> to vector<16x128xf32>
      %26 = arith.addf %23, %25 : vector<16x128xf32>
      %27 = tpu.iota {dimensions = array<i32: 1>} : vector<16x128xi32>
      %28 = math.absf %26 : vector<16x128xf32>
      %cst_19 = arith.constant 0.000000e+00 : f32
      %29 = vector.broadcast %cst_19 : f32 to vector<16x128xf32>
      %30 = arith.subf %29, %28 : vector<16x128xf32>
      %31 = math.exp %30 : vector<16x128xf32>
      %cst_20 = arith.constant 0.000000e+00 : f32
      %32 = vector.broadcast %cst_20 : f32 to vector<16x128xf32>
      %33 = arith.cmpf oge, %26, %32 : vector<16x128xf32>
      %cst_21 = arith.constant 1.000000e+00 : f32
      %34 = vector.broadcast %cst_21 : f32 to vector<16x128xf32>
      %35 = arith.select %33, %34, %31 : vector<16x128xi1>, vector<16x128xf32>
      %cst_22 = arith.constant 1.000000e+00 : f32
      %36 = vector.broadcast %cst_22 : f32 to vector<16x128xf32>
      %37 = arith.addf %36, %31 : vector<16x128xf32>
      %38 = tpu.reciprocal %37 {approx = true} : vector<16x128xf32> -> vector<16x128xf32>
      %39 = arith.mulf %35, %38 : vector<16x128xf32>
      %c1_i32 = arith.constant 1 : i32
      %40 = vector.broadcast %c1_i32 : i32 to vector<16x128xi32>
      %41 = arith.cmpi slt, %27, %40 : vector<16x128xi32>
      %cst_23 = arith.constant 0.000000e+00 : f32
      %42 = vector.broadcast %cst_23 : f32 to vector<16x128xf32>
      %43 = arith.select %41, %39, %42 : vector<16x128xi1>, vector<16x128xf32>
      %c1_i32_24 = arith.constant 1 : i32
      %44 = vector.broadcast %c1_i32_24 : i32 to vector<16x128xi32>
      %45 = arith.cmpi sge, %27, %44 : vector<16x128xi32>
      %c7_i32 = arith.constant 7 : i32
      %46 = vector.broadcast %c7_i32 : i32 to vector<16x128xi32>
      %47 = arith.cmpi slt, %27, %46 : vector<16x128xi32>
      %48 = arith.andi %45, %47 : vector<16x128xi1>
      %cst_25 = arith.constant -1.000000e+30 : f32
      %49 = vector.broadcast %cst_25 : f32 to vector<16x128xf32>
      %50 = arith.select %48, %26, %49 : vector<16x128xi1>, vector<16x128xf32>
      %cst_26 = arith.constant dense<0xFF800000> : vector<16xf32>
      %51 = vector.multi_reduction <maximumf>, %50, %cst_26 [1] : vector<16x128xf32> to vector<16xf32>
      %52 = vector.shape_cast %51 : vector<16xf32> to vector<16x1xf32>
      %53 = vector.broadcast %52 : vector<16x1xf32> to vector<16x128xf32>
      %54 = arith.subf %50, %53 : vector<16x128xf32>
      %55 = math.exp %54 : vector<16x128xf32>
      %cst_27 = arith.constant dense<0.000000e+00> : vector<16xf32>
      %56 = vector.multi_reduction <add>, %55, %cst_27 [1] : vector<16x128xf32> to vector<16xf32>
      %57 = vector.shape_cast %56 : vector<16xf32> to vector<16x1xf32>
      %58 = tpu.reciprocal %57 {approx = true} : vector<16x1xf32> -> vector<16x1xf32>
      %59 = vector.broadcast %58 : vector<16x1xf32> to vector<16x128xf32>
      %60 = arith.mulf %55, %59 : vector<16x128xf32>
      %61 = arith.addf %43, %60 : vector<16x128xf32>
      %c7_i32_28 = arith.constant 7 : i32
      %62 = vector.broadcast %c7_i32_28 : i32 to vector<16x128xi32>
      %63 = arith.cmpi sge, %27, %62 : vector<16x128xi32>
      %c12_i32 = arith.constant 12 : i32
      %64 = vector.broadcast %c12_i32 : i32 to vector<16x128xi32>
      %65 = arith.cmpi slt, %27, %64 : vector<16x128xi32>
      %66 = arith.andi %63, %65 : vector<16x128xi1>
      %cst_29 = arith.constant -1.000000e+30 : f32
      %67 = vector.broadcast %cst_29 : f32 to vector<16x128xf32>
      %68 = arith.select %66, %26, %67 : vector<16x128xi1>, vector<16x128xf32>
      %cst_30 = arith.constant dense<0xFF800000> : vector<16xf32>
      %69 = vector.multi_reduction <maximumf>, %68, %cst_30 [1] : vector<16x128xf32> to vector<16xf32>
      %70 = vector.shape_cast %69 : vector<16xf32> to vector<16x1xf32>
      %71 = vector.broadcast %70 : vector<16x1xf32> to vector<16x128xf32>
      %72 = arith.subf %68, %71 : vector<16x128xf32>
      %73 = math.exp %72 : vector<16x128xf32>
      %cst_31 = arith.constant dense<0.000000e+00> : vector<16xf32>
      %74 = vector.multi_reduction <add>, %73, %cst_31 [1] : vector<16x128xf32> to vector<16xf32>
      %75 = vector.shape_cast %74 : vector<16xf32> to vector<16x1xf32>
      %76 = tpu.reciprocal %75 {approx = true} : vector<16x1xf32> -> vector<16x1xf32>
      %77 = vector.broadcast %76 : vector<16x1xf32> to vector<16x128xf32>
      %78 = arith.mulf %73, %77 : vector<16x128xf32>
      %79 = arith.addf %61, %78 : vector<16x128xf32>
      %c0_32 = arith.constant 0 : index
      %c0_33 = arith.constant 0 : index
      %80 = vector.load %arg7[%c0_32, %c0_33] : memref<16x128xf32, #tpu.memory_space<vmem>>, vector<16x128xf32>
      tpu.vector_store %arg7[%c0_32, %c0_33], %79 {strides = array<i32>} : memref<16x128xf32, #tpu.memory_space<vmem>>, vector<16x128xf32>,
    } else {
    }
    return
  }
  func.func @transform_0(%arg0: i32, %arg1: i32) -> (i32, i32) {
    %c0_i32 = arith.constant 0 : i32
    return %arg0, %arg1 : i32, i32
  }
  func.func @transform_1(%arg0: i32, %arg1: i32) -> (i32, i32) {
    %c0_i32 = arith.constant 0 : i32
    %c0_i32_0 = arith.constant 0 : i32
    return %arg1, %c0_i32 : i32, i32
  }
  func.func @transform_2(%arg0: i32, %arg1: i32) -> (i32, i32) {
    %c0_i32 = arith.constant 0 : i32
    %c0_i32_0 = arith.constant 0 : i32
    %c0_i32_1 = arith.constant 0 : i32
    return %c0_i32, %c0_i32_0 : i32, i32
  }
  func.func @transform_3(%arg0: i32, %arg1: i32) -> (i32, i32) {
    %c0_i32 = arith.constant 0 : i32
    %c0_i32_0 = arith.constant 0 : i32
    %c0_i32_1 = arith.constant 0 : i32
    return %c0_i32, %c0_i32_0 : i32, i32
  }
  func.func @transform_4(%arg0: i32, %arg1: i32) -> (i32, i32) {
    %c0_i32 = arith.constant 0 : i32
    %c0_i32_0 = arith.constant 0 : i32
    %c0_i32_1 = arith.constant 0 : i32
    return %c0_i32, %c0_i32_0 : i32, i32
  }
  func.func @transform_5(%arg0: i32, %arg1: i32) -> (i32, i32) {
    %c0_i32 = arith.constant 0 : i32
    %c0_i32_0 = arith.constant 0 : i32
    return %arg0, %c0_i32 : i32, i32
  }
}

</mosaic_0001>

<bundles_post_ra>
// kernel: discriminator_forward.1
= control target key start
LH: loop header
LB: loop body
LE: loop exit
PB: predicated region body
PF: predicated region fallthrough
CT: control target
= control target key end

     0   :  { %10 = vsyncpa [#allocation4], 0  ;;  %s1842_s0 = inlined_call_operand.vmem [shape: bf16[16,64], index: 0, kind: input, shape index: {}]   ;;  %s1843_s1 = inlined_call_operand.hbm [shape: bf16[64,1024], index: 1, kind: input, shape index: {}]   ;;  %s1844_s2 = inlined_call_operand.vmem [shape: f32[1,1024], index: 2, kind: input, shape index: {}]   ;;  %s1845_s3 = inlined_call_operand.hbm [shape: bf16[1024,128], index: 3, kind: input, shape index: {}]   ;;  %s1846_s4 = inlined_call_operand.vmem [shape: f32[1,128], index: 4, kind: input, shape index: {}]   ;;  %s1847_s5 = inlined_call_operand.vmem [shape: f32[16,128], index: 5, kind: output, shape index: {}]  }
   0x1   :  { %11 = vsyncpa [#allocation6], 0  ;;  %s1723_s18 = smov [#allocation3]  }
   0x2   :  { %s19_s19 = sshll.u32 %s1723_s18, 4  ;;  %s20_s19 = int_to_ptr.vmem [resolvable:$true] %s19_s19 }
   0x3   :  { %s1687_s20 = scalar_lea.vmem %s20_s19, 4096  ;;  %p1692_p1 = scmp.lt.s32.totalorder %s20_s19, %s20_s19 }
   0x4   :  { %p1688_p0 = scmp.ne.s32.totalorder %s20_s19, %s1687_s20  ;;  %p1693_p2 = scmp.lt.s32.totalorder %s1687_s20, %s1687_s20 }
   0x6   :  { %p1694_p3 = por %p1693_p2, %p1692_p1 }
   0x8   :  { %p1695_p4 = pnand %p1694_p3, %p1688_p0 }
   0xa   :  { %1698 = shalt.err (!%p1695_p4)
}
   0xb   :  { %s1724_s21 = smov 512   ;;  %s1725_s22 = smov 32  }
   0xc   :  { %25 = dma.hbm_to_vmem [thread:$0]  %s1843_s1, 4096, %s20_s19, [#allocation4], %s1724_s21, %s1724_s21, %s1725_s22  }
   0xd   :  { %s1726_s25 = smov [#allocation5]  }
   0xe   :  { %s33_s26 = sshll.u32 %s1726_s25, 4  ;;  %s34_s26 = int_to_ptr.vmem [resolvable:$true] %s33_s26 }
   0xf   :  { %s1707_s27 = scalar_lea.vmem %s34_s26, 8192  ;;  %p1712_p6 = scmp.lt.s32.totalorder %s34_s26, %s34_s26 }
  0x10   :  { %p1708_p5 = scmp.ne.s32.totalorder %s34_s26, %s1707_s27  ;;  %p1713_p7 = scmp.lt.s32.totalorder %s1707_s27, %s1707_s27 }
  0x12   :  { %p1714_p8 = por %p1713_p7, %p1712_p6 }
  0x14   :  { %p1715_p9 = pnand %p1714_p8, %p1708_p5 }
  0x16   :  { %1718 = shalt.err (!%p1715_p9)
}
  0x17   :  { %s1727_s28 = smov 64   ;;  %s1728_s29 = smov 4  }
  0x18   :  { %39 = dma.hbm_to_vmem [thread:$0]  %s1845_s3, 8192, %s34_s26, [#allocation6], %s1727_s28, %s1727_s28, %s1728_s29  }
  0x19   :  { %1719 = dma.done.wait [#allocation4], 4096  }
  0x1a   :  { %1720 = vsyncadd [#allocation4], 4294963200 }
  0x1b   :  { %1721 = dma.done.wait [#allocation6], 8192  }
  0x1c   :  { %1722 = vsyncadd [#allocation6], 4294959104  ;;  %v1729_v0 = vmov 0   ;;  %v75_v1 = vld [vmem:[#allocation3 + $0xc0] sm:$0xff]  ;;  %v76_v3 = vld [vmem:[#allocation3 + $0xc8] sm:$0xff]  ;;  %vm248_vm0 = vcmask 523264  }
  0x1d   :  { %284 = vmatprep.mubr.bf16.mxu0 %v1729_v0  ;;  %327 = vmatprep.mubr.bf16.mxu1 %v1729_v0  ;;  %v79_v2 = vld [vmem:[#allocation3 + $0xe0] sm:$0xff]  ;;  %v80_v5 = vld [vmem:[#allocation3 + $0xe8] sm:$0xff]  ;;  %v77_v31 = vld [vmem:[#allocation3 + $0xd0] sm:$0xff] }
  0x1e   :  { %v1419_v4 = vcombine.high %v75_v1, %v79_v2  ;;  %v1418_v6 = vcombine.low %v75_v1, %v79_v2  ;;  %v67_v7 = vld [vmem:[#allocation3 + $0x80] sm:$0xff]  ;;  %v1421_v9 = vcombine.high %v76_v3, %v80_v5  ;;  %v1420_v10 = vcombine.low %v76_v3, %v80_v5  ;;  %v68_v12 = vld [vmem:[#allocation3 + $0x88] sm:$0xff]  ;;  %v81_v32 = vld [vmem:[#allocation3 + $0xf0] sm:$0xff] }
  0x1f   :  { %v71_v8 = vld [vmem:[#allocation3 + $0xa0] sm:$0xff]  ;;  %v72_v13 = vld [vmem:[#allocation3 + $0xa8] sm:$0xff]  ;;  %v78_v33 = vld [vmem:[#allocation3 + $0xd8] sm:$0xff]  ;;  %v1423_v39 = vcombine.high %v77_v31, %v81_v32  ;;  %v1422_v44 = vcombine.low %v77_v31, %v81_v32 }
  0x20   :  { %v1411_v11 = vcombine.high %v67_v7, %v71_v8  ;;  %v59_v14 = vld [vmem:[#allocation3 + $0x40] sm:$0xff]  ;;  %260 = vmatprep.subr.bf16.mxu0 %v1419_v4  ;;  %v1413_v15 = vcombine.high %v68_v12, %v72_v13  ;;  %v60_v17 = vld [vmem:[#allocation3 + $0x48] sm:$0xff]  ;;  %303 = vmatprep.subr.bf16.mxu1 %v1421_v9  ;;  %v1410_v19 = vcombine.low %v67_v7, %v71_v8  ;;  %v82_v34 = vld [vmem:[#allocation3 + $0xf8] sm:$0xff] }
  0x21   :  { %v63_v16 = vld [vmem:[#allocation3 + $0x60] sm:$0xff]  ;;  %v64_v18 = vld [vmem:[#allocation3 + $0x68] sm:$0xff]  ;;  %261 = vmatpush1.bf16.msra.mxu0 %v1418_v6  ;;  %304 = vmatpush1.bf16.msra.mxu1 %v1420_v10  ;;  %v1412_v20 = vcombine.low %v68_v12, %v72_v13  ;;  %v69_v36 = vld [vmem:[#allocation3 + $0x90] sm:$0xff]  ;;  %v1425_v41 = vcombine.high %v78_v33, %v82_v34  ;;  %v1424_v46 = vcombine.low %v78_v33, %v82_v34 }
  0x22   :  { %262 = vmatprep.subr.bf16.mxu0 %v1411_v11  ;;  %v1403_v21 = vcombine.high %v59_v14, %v63_v16  ;;  %305 = vmatprep.subr.bf16.mxu1 %v1413_v15  ;;  %v1405_v22 = vcombine.high %v60_v17, %v64_v18  ;;  %v51_v23 = vld [vmem:[#allocation3] sm:$0xff]  ;;  %v52_v25 = vld [vmem:[#allocation3 + $0x8] sm:$0xff]  ;;  %v1402_v27 = vcombine.low %v59_v14, %v63_v16  ;;  %v73_v40 = vld [vmem:[#allocation3 + $0xb0] sm:$0xff] }
  0x23   :  { %v55_v24 = vld [vmem:[#allocation3 + $0x20] sm:$0xff]  ;;  %v56_v26 = vld [vmem:[#allocation3 + $0x28] sm:$0xff]  ;;  %v1404_v28 = vcombine.low %v60_v17, %v64_v18  ;;  %v70_v42 = vld [vmem:[#allocation3 + $0x98] sm:$0xff]  ;;  %v1415_v47 = vcombine.high %v69_v36, %v73_v40  ;;  %v1414_v52 = vcombine.low %v69_v36, %v73_v40  ;;  %v517_v36 = vlaneseq }
  0x24   :  { %v1395_v29 = vcombine.high %v51_v23, %v55_v24  ;;  %v1397_v30 = vcombine.high %v52_v25, %v56_v26  ;;  %v1394_v35 = vcombine.low %v51_v23, %v55_v24  ;;  %v1396_v37 = vcombine.low %v52_v25, %v56_v26  ;;  %v1771_v38 = vld [vmem:[%s1842_s0] sm:$0xff]   ;;  %v74_v43 = vld [vmem:[#allocation3 + $0xb8] sm:$0xff]  ;;  %v61_v45 = vld [vmem:[#allocation3 + $0x50] sm:$0xff] }
  0x25   :  { %263 = vmatpush1.bf16.msra.mxu0 %v1410_v19  ;;  %306 = vmatpush1.bf16.msra.mxu1 %v1412_v20  ;;  %v65_v48 = vld [vmem:[#allocation3 + $0x70] sm:$0xff]  ;;  %v1417_v49 = vcombine.high %v70_v42, %v74_v43  ;;  %v62_v50 = vld [vmem:[#allocation3 + $0x58] sm:$0xff]  ;;  %v1416_v54 = vcombine.low %v70_v42, %v74_v43  ;;  %v1599_v10 = vld [vmem:[#allocation5 + $0x68] sm:$0xff]  }
  0x26   :  { %264 = vmatprep.subr.bf16.mxu0 %v1403_v21  ;;  %307 = vmatprep.subr.bf16.mxu1 %v1405_v22  ;;  %v66_v51 = vld [vmem:[#allocation3 + $0x78] sm:$0xff]  ;;  %v53_v53 = vld [vmem:[#allocation3 + $0x10] sm:$0xff]  ;;  %v1407_v55 = vcombine.high %v61_v45, %v65_v48  ;;  %v1406_v60 = vcombine.low %v61_v45, %v65_v48  ;;  %v1600_v11 = vld [vmem:[#allocation5 + $0xe8] sm:$0xff]  }
  0x27   :  { %v57_v56 = vld [vmem:[#allocation3 + $0x30] sm:$0xff]  ;;  %v1409_v57 = vcombine.high %v62_v50, %v66_v51  ;;  %v54_v58 = vld [vmem:[#allocation3 + $0x18] sm:$0xff]  ;;  %v1408_v61 = vcombine.low %v62_v50, %v66_v51  ;;  %v1601_v12 = vld [vmem:[#allocation5 + $0x28] sm:$0xff]  }
  0x28   :  { %v58_v59 = vld [vmem:[#allocation3 + $0x38] sm:$0xff]  ;;  %v1399_v62 = vcombine.high %v53_v53, %v57_v56  ;;  %v1398_v1 = vcombine.low %v53_v53, %v57_v56  ;;  %v1595_v7 = vld [vmem:[#allocation5 + $0x70] sm:$0xff]   ;;  %v1602_v13 = vld [vmem:[#allocation5 + $0xa8] sm:$0xff]  }
  0x29   :  { %265 = vmatpush1.bf16.msra.mxu0 %v1402_v27  ;;  %308 = vmatpush1.bf16.msra.mxu1 %v1404_v28  ;;  %v1401_v63 = vcombine.high %v54_v58, %v58_v59  ;;  %v1591_v2 = vld [vmem:[#allocation5 + $0x78] sm:$0xff]   ;;  %v1400_v3 = vcombine.low %v54_v58, %v58_v59  ;;  %v1597_v8 = vld [vmem:[#allocation5 + $0x30] sm:$0xff]   ;;  %v1603_v14 = vld [vmem:[#allocation5 + $0x60] sm:$0xff]  }
  0x2a   :  { %266 = vmatprep.subr.bf16.mxu0 %v1395_v29  ;;  %309 = vmatprep.subr.bf16.mxu1 %v1397_v30  ;;  %v1592_v4 = vld [vmem:[#allocation5 + $0xf8] sm:$0xff]   ;;  %v1598_v9 = vld [vmem:[#allocation5 + $0xb0] sm:$0xff]   ;;  %v1604_v15 = vld [vmem:[#allocation5 + $0xe0] sm:$0xff]  }
  0x2b   :  { %v1593_v5 = vld [vmem:[#allocation5 + $0x38] sm:$0xff]   ;;  %v1605_v16 = vld [vmem:[#allocation5 + $0x20] sm:$0xff]   ;;  %v1611_v22 = vld [vmem:[#allocation5 + $0x50] sm:$0xff]  }
  0x2c   :  { %v1594_v6 = vld [vmem:[#allocation5 + $0xb8] sm:$0xff]   ;;  %v1606_v17 = vld [vmem:[#allocation5 + $0xa0] sm:$0xff]   ;;  %v1612_v23 = vld [vmem:[#allocation5 + $0xd0] sm:$0xff]  }
  0x2d   :  { %267 = vmatpush1.bf16.msra.mxu0 %v1394_v35  ;;  %310 = vmatpush1.bf16.msra.mxu1 %v1396_v37  ;;  %v1607_v18 = vld [vmem:[#allocation5 + $0x58] sm:$0xff]   ;;  %v1613_v24 = vld [vmem:[#allocation5 + $0x10] sm:$0xff]   ;;  %v1615_v26 = vld [vmem:[#allocation5 + $0x48] sm:$0xff]   ;;  %v1784_v37 = vshrl.u32 %v517_v36, 7 }
  0x2e   :  { %346 = vmatprep.subr.bf16.mxu0 %v1423_v39  ;;  %389 = vmatprep.subr.bf16.mxu1 %v1425_v41  ;;  %v1608_v19 = vld [vmem:[#allocation5 + $0xd8] sm:$0xff]   ;;  %v1614_v25 = vld [vmem:[#allocation5 + $0x90] sm:$0xff]   ;;  %v1616_v27 = vld [vmem:[#allocation5 + $0xc8] sm:$0xff]  }
  0x2f   :  { %v1609_v20 = vld [vmem:[#allocation5 + $0x18] sm:$0xff]   ;;  %v1617_v28 = vld [vmem:[#allocation5 + $0x8] sm:$0xff]   ;;  %v1619_v30 = vld [vmem:[#allocation5 + $0x40] sm:$0xff]   ;;  %v523_v40 = vsub.s32 1, %v1784_v37  ;;  %v531_v41 = vsub.s32 3, %v1784_v37  ;;  %v527_v42 = vsub.s32 2, %v1784_v37 }
  0x30   :  { %1426 = vmatmul.mubr.msk.bf16.vlgmr.msra.gmra.mxu0 %vm248_vm0, %v1771_v38  ;;  %1427 = vmatmul.mubr.msk.bf16.vlgmr.msra.gmra.mxu1 %vm248_vm0, %v1771_v38  ;;  %v1610_v21 = vld [vmem:[#allocation5 + $0x98] sm:$0xff]   ;;  %v1618_v29 = vld [vmem:[#allocation5 + $0x88] sm:$0xff]   ;;  %v1620_v31 = vld [vmem:[#allocation5 + $0xc0] sm:$0xff]   ;;  %v539_v58 = vsub.s32 5, %v1784_v37 }
  0x31   :  { %347 = vmatpush1.bf16.msra.mxu0 %v1422_v44  ;;  %390 = vmatpush1.bf16.msra.mxu1 %v1424_v46  ;;  %v1621_v32 = vld [vmem:[#allocation5] sm:$0xff]   ;;  %v1623_v34 = vld [vmem:[#allocation5 + $0x178] sm:$0xff]  }
  0x32   :  { %348 = vmatprep.subr.bf16.mxu0 %v1415_v47  ;;  %391 = vmatprep.subr.bf16.mxu1 %v1417_v49  ;;  %v1622_v33 = vld [vmem:[#allocation5 + $0x80] sm:$0xff]   ;;  %v1624_v35 = vld [vmem:[#allocation5 + $0x1f8] sm:$0xff]  }
  0x33   :  { %370 = vmatprep.mubr.bf16.mxu0 %v1729_v0  ;;  %413 = vmatprep.mubr.bf16.mxu1 %v1729_v0  ;;  %v1596_v0 = vld [vmem:[#allocation5 + $0xf0] sm:$0xff]   ;;  %v1790_v39 = vld [vmem:[%s1844_s2] sm:$0xff] }
  0x34   :  { %v524_v44 = vrot.slane %v1790_v39, %v523_v40  ;;  %v532_v46 = vrot.slane %v1790_v39, %v531_v41  ;;  %v528_v48 = vrot.slane %v1790_v39, %v527_v42  ;;  %v1634_v42 = vld [vmem:[#allocation5 + $0x1a8] sm:$0xff]  }
  0x35   :  { %349 = vmatpush1.bf16.msra.mxu0 %v1414_v52  ;;  %392 = vmatpush1.bf16.msra.mxu1 %v1416_v54 }
  0x36   :  { %350 = vmatprep.subr.bf16.mxu0 %v1407_v55  ;;  %393 = vmatprep.subr.bf16.mxu1 %v1409_v57 }
  0x39   :  { %351 = vmatpush1.bf16.msra.mxu0 %v1406_v60  ;;  %394 = vmatpush1.bf16.msra.mxu1 %v1408_v61 }
  0x3a   :  { %352 = vmatprep.subr.bf16.mxu0 %v1399_v62  ;;  %395 = vmatprep.subr.bf16.mxu1 %v1401_v63 }
  0x3d   :  { %353 = vmatpush1.bf16.msra.mxu0 %v1398_v1  ;;  %396 = vmatpush1.bf16.msra.mxu1 %v1400_v3 }
  0x3e   :  { %1495 = vmatprep.subr.bf16.mxu0 %v1591_v2  ;;  %1517 = vmatprep.subr.bf16.mxu1 %v1592_v4 }
  0x40   :  { %1428 = vmatmul.mubr.msk.bf16.vlgmr.msra.gmra.mxu0 %vm248_vm0, %v1771_v38  ;;  %1429 = vmatmul.mubr.msk.bf16.vlgmr.msra.gmra.mxu1 %vm248_vm0, %v1771_v38  ;;  %v519_v38 = vsub.s32 0, %v1784_v37 }
  0x41   :  { %1496 = vmatpush3.bf16.msra.mxu0 %v1593_v5  ;;  %1518 = vmatpush3.bf16.msra.mxu1 %v1594_v6 }
  0x42   :  { %1497 = vmatprep.subr.bf16.mxu0 %v1595_v7  ;;  %1519 = vmatprep.subr.bf16.mxu1 %v1596_v0  ;;  %v520_v43 = vrot.slane %v1790_v39, %v519_v38  ;;  %v1633_v38 = vld [vmem:[#allocation5 + $0x128] sm:$0xff]  }
  0x45   :  { %1498 = vmatpush3.bf16.msra.mxu0 %v1597_v8  ;;  %1520 = vmatpush3.bf16.msra.mxu1 %v1598_v9 }
  0x46   :  { %1499 = vmatprep.subr.bf16.mxu0 %v1599_v10  ;;  %1521 = vmatprep.subr.bf16.mxu1 %v1600_v11 }
  0x49   :  { %1500 = vmatpush3.bf16.msra.mxu0 %v1601_v12  ;;  %1522 = vmatpush3.bf16.msra.mxu1 %v1602_v13  ;;  %v547_v12 = vsub.s32 7, %v1784_v37 }
  0x4a   :  { %1501 = vmatprep.subr.bf16.mxu0 %v1603_v14  ;;  %1523 = vmatprep.subr.bf16.mxu1 %v1604_v15 }
  0x4d   :  { %1502 = vmatpush3.bf16.msra.mxu0 %v1605_v16  ;;  %1524 = vmatpush3.bf16.msra.mxu1 %v1606_v17  ;;  %v1625_v17 = vld [vmem:[#allocation5 + $0x138] sm:$0xff]  }
  0x4e   :  { %1503 = vmatprep.subr.bf16.mxu0 %v1607_v18  ;;  %1525 = vmatprep.subr.bf16.mxu1 %v1608_v19 }
  0x51   :  { %1504 = vmatpush3.bf16.msra.mxu0 %v1609_v20  ;;  %1526 = vmatpush3.bf16.msra.mxu1 %v1610_v21  ;;  %v1626_v21 = vld [vmem:[#allocation5 + $0x1b8] sm:$0xff]  }
  0x52   :  { %1505 = vmatprep.subr.bf16.mxu0 %v1611_v22  ;;  %1527 = vmatprep.subr.bf16.mxu1 %v1612_v23  ;;  %v1627_v22 = vld [vmem:[#allocation5 + $0x170] sm:$0xff]  }
  0x55   :  { %1506 = vmatpush3.bf16.msra.mxu0 %v1613_v24  ;;  %1528 = vmatpush3.bf16.msra.mxu1 %v1614_v25  ;;  %v1628_v24 = vld [vmem:[#allocation5 + $0x1f0] sm:$0xff]   ;;  %v540_v25 = vrot.slane %v1790_v39, %v539_v58  ;;  %v1640_v58 = vld [vmem:[#allocation5 + $0x1d8] sm:$0xff]  }
  0x56   :  { %1507 = vmatprep.subr.bf16.mxu0 %v1615_v26  ;;  %1529 = vmatprep.subr.bf16.mxu1 %v1616_v27  ;;  %v1629_v26 = vld [vmem:[#allocation5 + $0x130] sm:$0xff]  }
  0x59   :  { %1508 = vmatpush3.bf16.msra.mxu0 %v1617_v28  ;;  %1530 = vmatpush3.bf16.msra.mxu1 %v1618_v29  ;;  %v548_v28 = vrot.slane %v1790_v39, %v547_v12  ;;  %v1630_v29 = vld [vmem:[#allocation5 + $0x1b0] sm:$0xff]   ;;  %v1648_v12 = vld [vmem:[#allocation5 + $0x1c8] sm:$0xff]  }
  0x5a   :  { %1509 = vmatprep.subr.bf16.mxu0 %v1619_v30  ;;  %1531 = vmatprep.subr.bf16.mxu1 %v1620_v31  ;;  %v1631_v30 = vld [vmem:[#allocation5 + $0x168] sm:$0xff]  }
  0x5d   :  { %1510 = vmatpush3.bf16.msra.mxu0 %v1621_v32  ;;  %1532 = vmatpush3.bf16.msra.mxu1 %v1622_v33  ;;  %v1632_v32 = vld [vmem:[#allocation5 + $0x1e8] sm:$0xff]  }
  0x5e   :  { %1539 = vmatprep.subr.bf16.mxu0 %v1623_v34  ;;  %1561 = vmatprep.subr.bf16.mxu1 %v1624_v35 }
  0xf0   :  { %v286_v45 = vpop.f32.mrf.mxu0  ;;  %v329_v47 = vpop.f32.mrf.mxu1 }
  0xf1   :  { %v557_v49 = vadd.f32 %v520_v43, %v286_v45  ;;  %v559_v55 = vadd.f32 %v528_v48, %v329_v47 }
  0xf2   :  { %v288_v50 = vpop.f32.mrf.mxu0  ;;  %v331_v52 = vpop.f32.mrf.mxu1 }
  0xf3   :  { %v558_v51 = vadd.f32 %v524_v44, %v288_v50  ;;  %v560_v53 = vadd.f32 %v532_v46, %v331_v52  ;;  %vm573_vm1 = vcmp.ge.f32.partialorder %v557_v49, 0.0  ;;  %v589_v59 = vmul.f32 0.1, %v557_v49 }
  0xf4   :  { %v290_v54 = vpop.f32.mrf.mxu0  ;;  %v333_v57 = vpop.f32.mrf.mxu1  ;;  %v591_v6 = vmul.f32 0.1, %v559_v55  ;;  %vm575_vm7 = vcmp.ge.f32.partialorder %v559_v55, 0.0 }
  0xf5   :  { %v565_v56 = vadd.f32 %v520_v43, %v290_v54  ;;  %vm574_vm2 = vcmp.ge.f32.partialorder %v558_v51, 0.0  ;;  %v567_v60 = vadd.f32 %v528_v48, %v333_v57  ;;  %v590_v62 = vmul.f32 0.1, %v558_v51 }
  0xf6   :  { %v292_v61 = vpop.f32.mrf.mxu0  ;;  %v335_v2 = vpop.f32.mrf.mxu1  ;;  %v592_v3 = vmul.f32 0.1, %v560_v53  ;;  %vm576_vm5 = vcmp.ge.f32.partialorder %v560_v53, 0.0  ;;  %v605_v13 = vsel %vm573_vm1, %v557_v49, %v589_v59  ;;  %v607_v18 = vsel %vm575_vm7, %v559_v55, %v591_v6  ;;  %v1639_v55 = vld [vmem:[#allocation5 + $0x158] sm:$0xff]  }
  0xf7   :  { %vm581_vm3 = vcmp.ge.f32.partialorder %v565_v56, 0.0  ;;  %v597_v63 = vmul.f32 0.1, %v565_v56  ;;  %v566_v1 = vadd.f32 %v524_v44, %v292_v61  ;;  %vm583_vm4 = vcmp.ge.f32.partialorder %v567_v60, 0.0  ;;  %v1635_v44 = vld [vmem:[#allocation5 + $0x160] sm:$0xff]  }
  0xf8   :  { %v599_v4 = vmul.f32 0.1, %v567_v60  ;;  %v568_v5 = vadd.f32 %v532_v46, %v335_v2  ;;  %v606_v10 = vsel %vm574_vm2, %v558_v51, %v590_v62  ;;  %v608_v15 = vsel %vm576_vm5, %v560_v53, %v592_v3  ;;  %v1636_v46 = vld [vmem:[#allocation5 + $0x1e0] sm:$0xff]   ;;  %v1642_v3 = vld [vmem:[#allocation5 + $0x198] sm:$0xff]  }
  0xf9   :  { %vm582_vm6 = vcmp.ge.f32.partialorder %v566_v1, 0.0  ;;  %v598_v7 = vmul.f32 0.1, %v566_v1  ;;  %v613_v0 = vsel %vm581_vm3, %v565_v56, %v597_v63  ;;  %v1637_v51 = vld [vmem:[#allocation5 + $0x120] sm:$0xff]   ;;  %v535_v57 = vsub.s32 4, %v1784_v37  ;;  %v1641_v63 = vld [vmem:[#allocation5 + $0x118] sm:$0xff]  }
  0xfa   :  { %vm584_vm8 = vcmp.ge.f32.partialorder %v568_v5, 0.0  ;;  %v600_v8 = vmul.f32 0.1, %v568_v5  ;;  %v615_v9 = vsel %vm583_vm4, %v567_v60, %v599_v4  ;;  %v621_v19 = vpack.c.bf16 %v613_v0, %v605_v13  ;;  %v1638_v53 = vld [vmem:[#allocation5 + $0x1a0] sm:$0xff]   ;;  %v1643_v4 = vld [vmem:[#allocation5 + $0x150] sm:$0xff]  }
  0xfb   :  { %v614_v11 = vsel %vm582_vm6, %v566_v1, %v598_v7  ;;  %v623_v23 = vpack.c.bf16 %v615_v9, %v607_v18  ;;  %v543_v61 = vsub.s32 6, %v1784_v37  ;;  %v536_v6 = vrot.slane %v1790_v39, %v535_v57  ;;  %v1644_v7 = vld [vmem:[#allocation5 + $0x1d0] sm:$0xff]   ;;  %v1647_v9 = vld [vmem:[#allocation5 + $0x148] sm:$0xff]  }
  0xfc   :  { %v622_v14 = vpack.c.bf16 %v614_v11, %v606_v10  ;;  %v616_v16 = vsel %vm584_vm8, %v568_v5, %v600_v8  ;;  %v1645_v37 = vld [vmem:[#allocation5 + $0x110] sm:$0xff]  }
  0xfd   :  { %v624_v20 = vpack.c.bf16 %v616_v16, %v608_v15  ;;  %v544_v0 = vrot.slane %v1790_v39, %v543_v61  ;;  %v1646_v8 = vld [vmem:[#allocation5 + $0x190] sm:$0xff]   ;;  %v1649_v15 = vld [vmem:[#allocation5 + $0x108] sm:$0xff]   ;;  %v1651_v16 = vld [vmem:[#allocation5 + $0x140] sm:$0xff]  }
  0xfe   :  { %1180 = vmatprep.mubr.bf16.mxu0 %v622_v14  ;;  %v1650_v39 = vld [vmem:[#allocation5 + $0x188] sm:$0xff]  }
  0xff   :  { %1221 = vmatprep.mubr.bf16.mxu1 %v624_v20  ;;  %1181 = vmatmul.mubr.bf16.vlgmr.msra.gmra.mxu0 %v621_v19  ;;  %v1652_v19 = vld [vmem:[#allocation5 + $0x1c0] sm:$0xff]  }
 0x100   :  { %1222 = vmatmul.mubr.bf16.vlgmr.msra.gmra.mxu1 %v623_v23  ;;  %1540 = vmatpush3.bf16.msra.mxu0 %v1625_v17  ;;  %v1804_v27 = vpop.f32.mrf.mxu0  ;;  %v1807_v31 = vpop.f32.mrf.mxu1  ;;  %v1654_v23 = vld [vmem:[#allocation5 + $0x180] sm:$0xff]  }
 0x101   :  { %1562 = vmatpush3.bf16.msra.mxu1 %v1626_v21  ;;  %1541 = vmatprep.subr.bf16.mxu0 %v1627_v22  ;;  %v561_v10 = vadd.f32 %v536_v6, %v1804_v27  ;;  %v563_v13 = vadd.f32 %v544_v0, %v1807_v31  ;;  %v1653_v22 = vld [vmem:[#allocation5 + $0x100] sm:$0xff]  }
 0x102   :  { %1563 = vmatprep.subr.bf16.mxu1 %v1628_v24  ;;  %v374_v33 = vpop.f32.mrf.mxu0  ;;  %v417_v35 = vpop.f32.mrf.mxu1 }
 0x103   :  { %v562_v34 = vadd.f32 %v540_v25, %v374_v33  ;;  %v564_v41 = vadd.f32 %v548_v28, %v417_v35  ;;  %v593_v17 = vmul.f32 0.1, %v561_v10  ;;  %vm577_vm13 = vcmp.ge.f32.partialorder %v561_v10, 0.0 }
 0x104   :  { %1542 = vmatpush3.bf16.msra.mxu0 %v1629_v26  ;;  %v376_v40 = vpop.f32.mrf.mxu0  ;;  %v419_v45 = vpop.f32.mrf.mxu1  ;;  %v595_v20 = vmul.f32 0.1, %v563_v13  ;;  %vm579_vm15 = vcmp.ge.f32.partialorder %v563_v13, 0.0 }
 0x105   :  { %1564 = vmatpush3.bf16.msra.mxu1 %v1630_v29  ;;  %1543 = vmatprep.subr.bf16.mxu0 %v1631_v30  ;;  %v594_v43 = vmul.f32 0.1, %v562_v34  ;;  %vm578_vm9 = vcmp.ge.f32.partialorder %v562_v34, 0.0  ;;  %v596_v47 = vmul.f32 0.1, %v564_v41  ;;  %vm580_vm10 = vcmp.ge.f32.partialorder %v564_v41, 0.0 }
 0x106   :  { %1565 = vmatprep.subr.bf16.mxu1 %v1632_v32  ;;  %v378_v48 = vpop.f32.mrf.mxu0  ;;  %v421_v50 = vpop.f32.mrf.mxu1  ;;  %v569_v11 = vadd.f32 %v536_v6, %v376_v40  ;;  %v571_v14 = vadd.f32 %v544_v0, %v419_v45  ;;  %v609_v24 = vsel %vm577_vm13, %v561_v10, %v593_v17  ;;  %v611_v26 = vsel %vm579_vm15, %v563_v13, %v595_v20  ;;  %v1430_v40 = vld [vmem:[%s1846_s4] ss:$0 sm:$0xff] }
 0x107   :  { %v570_v49 = vadd.f32 %v540_v25, %v378_v48  ;;  %v572_v52 = vadd.f32 %v548_v28, %v421_v50  ;;  %v610_v56 = vsel %vm578_vm9, %v562_v34, %v594_v43  ;;  %v612_v60 = vsel %vm580_vm10, %v564_v41, %v596_v47 }
 0x108   :  { %1544 = vmatpush3.bf16.msra.mxu0 %v1633_v38  ;;  %v601_v18 = vmul.f32 0.1, %v569_v11  ;;  %vm585_vm14 = vcmp.ge.f32.partialorder %v569_v11, 0.0  ;;  %v603_v21 = vmul.f32 0.1, %v571_v14  ;;  %vm587_vm0 = vcmp.ge.f32.partialorder %v571_v14, 0.0 }
 0x109   :  { %1566 = vmatpush3.bf16.msra.mxu1 %v1634_v42  ;;  %1545 = vmatprep.subr.bf16.mxu0 %v1635_v44  ;;  %vm586_vm11 = vcmp.ge.f32.partialorder %v570_v49, 0.0  ;;  %v602_v54 = vmul.f32 0.1, %v570_v49  ;;  %vm588_vm12 = vcmp.ge.f32.partialorder %v572_v52, 0.0  ;;  %v604_v59 = vmul.f32 0.1, %v572_v52 }
 0x10a   :  { %1567 = vmatprep.subr.bf16.mxu1 %v1636_v46  ;;  %v617_v25 = vsel %vm585_vm14, %v569_v11, %v601_v18  ;;  %v619_v27 = vsel %vm587_vm0, %v571_v14, %v603_v21  ;;  %v1821_v42 = vand.u32 127, %v517_v36 }
 0x10b   :  { %v618_v62 = vsel %vm586_vm11, %v570_v49, %v602_v54  ;;  %v620_v2 = vsel %vm588_vm12, %v572_v52, %v604_v59  ;;  %v625_v28 = vpack.c.bf16 %v617_v25, %v609_v24  ;;  %v627_v29 = vpack.c.bf16 %v619_v27, %v611_v26 }
 0x10c   :  { %1546 = vmatpush3.bf16.msra.mxu0 %v1637_v51  ;;  %v626_v1 = vpack.c.bf16 %v618_v62, %v610_v56  ;;  %v628_v5 = vpack.c.bf16 %v620_v2, %v612_v60  ;;  %vm1360_vm1 = vcmp.ge.s32.totalorder %v1821_v42, 7  ;;  %vm1361_vm2 = vcmp.lt.s32.totalorder %v1821_v42, 12 }
 0x10d   :  { %1568 = vmatpush3.bf16.msra.mxu1 %v1638_v53  ;;  %1547 = vmatprep.subr.bf16.mxu0 %v1639_v55  ;;  %vm1335_vm3 = vcmp.ge.s32.totalorder %v1821_v42, 1  ;;  %vm1336_vm4 = vcmp.lt.s32.totalorder %v1821_v42, 7  ;;  %vm1827_vm5 = vmand %vm1360_vm1, %vm1361_vm2  ;;  %vm1332_vm8 = vcmp.lt.s32.totalorder %v1821_v42, 1 }
 0x10e   :  { %1569 = vmatprep.subr.bf16.mxu1 %v1640_v58  ;;  %1262 = vmatprep.mubr.bf16.mxu0 %v626_v1  ;;  %vm1337_vm6 = vmand %vm1335_vm3, %vm1336_vm4 }
 0x10f   :  { %1303 = vmatprep.mubr.bf16.mxu1 %v628_v5 }
 0x110   :  { %1548 = vmatpush3.bf16.msra.mxu0 %v1641_v63 }
 0x111   :  { %1570 = vmatpush3.bf16.msra.mxu1 %v1642_v3  ;;  %1549 = vmatprep.subr.bf16.mxu0 %v1643_v4 }
 0x112   :  { %1571 = vmatprep.subr.bf16.mxu1 %v1644_v7 }
 0x114   :  { %1550 = vmatpush3.bf16.msra.mxu0 %v1645_v37 }
 0x115   :  { %1572 = vmatpush3.bf16.msra.mxu1 %v1646_v8  ;;  %1551 = vmatprep.subr.bf16.mxu0 %v1647_v9 }
 0x116   :  { %1573 = vmatprep.subr.bf16.mxu1 %v1648_v12 }
 0x118   :  { %1552 = vmatpush3.bf16.msra.mxu0 %v1649_v15 }
 0x119   :  { %1574 = vmatpush3.bf16.msra.mxu1 %v1650_v39  ;;  %1553 = vmatprep.subr.bf16.mxu0 %v1651_v16 }
 0x11a   :  { %1575 = vmatprep.subr.bf16.mxu1 %v1652_v19 }
 0x11c   :  { %1554 = vmatpush3.bf16.msra.mxu0 %v1653_v22 }
 0x11d   :  { %1576 = vmatpush3.bf16.msra.mxu1 %v1654_v23 }
 0x11f   :  { %1263 = vmatmul.mubr.bf16.vlgmr.msra.gmra.mxu0 %v625_v28 }
 0x120   :  { %1304 = vmatmul.mubr.bf16.vlgmr.msra.gmra.mxu1 %v627_v29 }
 0x1bf   :  { %v1511_v30 = vpop.f32.mrf.mxu0 }
 0x1c0   :  { %v1533_v31 = vpop.f32.mrf.mxu1 }
 0x1c1   :  { %v1512_v32 = vpop.f32.mrf.mxu0 }
 0x1c2   :  { %v1534_v33 = vpop.f32.mrf.mxu1  ;;  %v1513_v35 = vadd.f32 %v1512_v32, %v1511_v30 }
 0x1c3   :  { %v1514_v34 = vpop.f32.mrf.mxu0  ;;  %v1535_v47 = vadd.f32 %v1534_v33, %v1533_v31 }
 0x1c4   :  { %v1536_v38 = vpop.f32.mrf.mxu1  ;;  %v1183_v43 = vadd.f32 %v1513_v35, %v1430_v40 }
 0x1c5   :  { %v1515_v41 = vpop.f32.mrf.mxu0 }
 0x1c6   :  { %v1516_v44 = vadd.f32 %v1515_v41, %v1514_v34  ;;  %v1537_v45 = vpop.f32.mrf.mxu1  ;;  %v1224_v50 = vadd.f32 %v1535_v47, %v1183_v43 }
 0x1c7   :  { %v1538_v36 = vadd.f32 %v1537_v45, %v1536_v38 }
 0x1c8   :  { %v1186_v51 = vadd.f32 %v1516_v44, %v1430_v40 }
 0x1ca   :  { %v1227_v60 = vadd.f32 %v1538_v36, %v1186_v51 }
 0x1df   :  { %v1555_v46 = vpop.f32.mrf.mxu0 }
 0x1e0   :  { %v1577_v48 = vpop.f32.mrf.mxu1 }
 0x1e1   :  { %v1556_v49 = vpop.f32.mrf.mxu0 }
 0x1e2   :  { %v1557_v52 = vadd.f32 %v1556_v49, %v1555_v46  ;;  %v1578_v53 = vpop.f32.mrf.mxu1 }
 0x1e3   :  { %v1558_v54 = vpop.f32.mrf.mxu0  ;;  %v1579_v56 = vadd.f32 %v1578_v53, %v1577_v48 }
 0x1e4   :  { %v1265_v55 = vadd.f32 %v1557_v52, %v1224_v50  ;;  %v1580_v57 = vpop.f32.mrf.mxu1 }
 0x1e5   :  { %v1559_v58 = vpop.f32.mrf.mxu0 }
 0x1e6   :  { %v1306_v61 = vadd.f32 %v1579_v56, %v1265_v55  ;;  %v1560_v62 = vadd.f32 %v1559_v58, %v1558_v54  ;;  %v1581_v63 = vpop.f32.mrf.mxu1 }
 0x1e7   :  { %v1582_v3 = vadd.f32 %v1581_v63, %v1580_v57 }
 0x1e8   :  { %v1314_v1 = vand.u32 2147483647, %v1306_v61  ;;  %v1268_v2 = vadd.f32 %v1560_v62, %v1227_v60  ;;  %v1363_v4 = vsel %vm1827_vm5, %v1306_v61, -1e+30  ;;  %v1338_v5 = vsel %vm1337_vm6, %v1306_v61, -1e+30 }
 0x1e9   :  { %1365 = vmax.xlane.f32.xlu1 %v1363_v4  ;;  %1340 = vmax.xlane.f32.xlu0 %v1338_v5  ;;  %vm1322_vm7 = vcmp.ge.f32.partialorder %v1306_v61, 0.0 }
 0x1ea   :  { %v1316_v6 = vsub.f32 0.0, %v1314_v1  ;;  %v1309_v7 = vadd.f32 %v1582_v3, %v1268_v2 }
 0x1ec   :  { %v1318_v0 = vmul.f32 1.442695, %v1316_v6  ;;  %v1315_v37 = vand.u32 2147483647, %v1309_v7  ;;  %v1364_v8 = vsel %vm1827_vm5, %v1309_v7, -1e+30 }
 0x1ed   :  { %v1339_v9 = vsel %vm1337_vm6, %v1309_v7, -1e+30  ;;  %1367 = vmax.xlane.f32.xlu1 %v1364_v8  ;;  %vm1323_vm9 = vcmp.ge.f32.partialorder %v1309_v7, 0.0 }
 0x1ee   :  { %1655 = vpow2.f32 %v1318_v0  ;;  %v1317_v10 = vsub.f32 0.0, %v1315_v37  ;;  %1342 = vmax.xlane.f32.xlu0 %v1339_v9 }
 0x1f0   :  { %v1320_v11 = vmul.f32 1.442695, %v1317_v10 }
 0x1f2   :  { %1657 = vpow2.f32 %v1320_v11 }
 0x1fb   :  { %v1656_v12 = vpop.eup %1655 }
 0x1fc   :  { %v1326_v13 = vadd.f32 1.0, %v1656_v12  ;;  %v1324_v16 = vsel %vm1322_vm7, 1.0, %v1656_v12 }
 0x1fe   :  { %1659 = vrcp.f32 %v1326_v13 }
 0x1ff   :  { %v1658_v14 = vpop.eup %1657 }
 0x200   :  { %v1327_v15 = vadd.f32 1.0, %v1658_v14  ;;  %v1325_v20 = vsel %vm1323_vm9, 1.0, %v1658_v14 }
 0x202   :  { %1661 = vrcp.f32 %v1327_v15 }
 0x20b   :  { %v1660_v39 = vpop.eup %1659 }
 0x20c   :  { %v1330_v17 = vmul.f32 %v1660_v39, %v1324_v16 }
 0x20e   :  { %v1333_v18 = vsel %vm1332_vm8, %v1330_v17, 0.0 }
 0x20f   :  { %v1662_v19 = vpop.eup %1661 }
 0x210   :  { %v1331_v21 = vmul.f32 %v1662_v19, %v1325_v20 }
 0x212   :  { %v1334_v22 = vsel %vm1332_vm8, %v1331_v21, 0.0 }
 0x272   :  { %v1366_v23 = vpop.xlane.xlu1 %1365  ;;  %v1341_v24 = vpop.xlane.xlu0 %1340 }
 0x273   :  { %v1369_v25 = vsub.f32 %v1363_v4, %v1366_v23  ;;  %v1344_v26 = vsub.f32 %v1338_v5, %v1341_v24 }
 0x275   :  { %v1346_v27 = vmul.f32 1.442695, %v1344_v26  ;;  %v1371_v30 = vmul.f32 1.442695, %v1369_v25 }
 0x276   :  { %v1368_v28 = vpop.xlane.xlu1 %1367 }
 0x277   :  { %v1343_v29 = vpop.xlane.xlu0 %1342  ;;  %1663 = vpow2.f32 %v1346_v27  ;;  %v1370_v32 = vsub.f32 %v1364_v8, %v1368_v28 }
 0x278   :  { %v1345_v31 = vsub.f32 %v1339_v9, %v1343_v29  ;;  %1665 = vpow2.f32 %v1371_v30 }
 0x279   :  { %v1373_v34 = vmul.f32 1.442695, %v1370_v32 }
 0x27a   :  { %v1348_v33 = vmul.f32 1.442695, %v1345_v31 }
 0x27c   :  { %1667 = vpow2.f32 %v1348_v33 }
 0x27d   :  { %1669 = vpow2.f32 %v1373_v34 }
 0x284   :  { %v1664_v35 = vpop.eup %1663 }
 0x285   :  { %1350 = vadd.xlane.f32.xlu0 %v1664_v35  ;;  %v1666_v38 = vpop.eup %1665 }
 0x289   :  { %v1668_v40 = vpop.eup %1667  ;;  %1375 = vadd.xlane.f32.xlu0 %v1666_v38 }
 0x28a   :  { %1352 = vadd.xlane.f32.xlu1 %v1668_v40  ;;  %v1670_v41 = vpop.eup %1669 }
 0x28e   :  { %1377 = vadd.xlane.f32.xlu1 %v1670_v41 }
 0x30e   :  { %v1351_v42 = vpop.xlane.xlu0 %1350 }
 0x30f   :  { %1671 = vrcp.f32 %v1351_v42 }
 0x312   :  { %v1376_v43 = vpop.xlane.xlu0 %1375 }
 0x313   :  { %v1353_v44 = vpop.xlane.xlu1 %1352  ;;  %1673 = vrcp.f32 %v1376_v43 }
 0x314   :  { %1675 = vrcp.f32 %v1353_v44 }
 0x317   :  { %v1378_v45 = vpop.xlane.xlu1 %1377 }
 0x318   :  { %1677 = vrcp.f32 %v1378_v45 }
 0x31c   :  { %v1672_v46 = vpop.eup %1671 }
 0x31d   :  { %v1356_v47 = vmul.f32 %v1672_v46, %v1664_v35 }
 0x31f   :  { %v1358_v50 = vadd.f32 %v1356_v47, %v1333_v18 }
 0x320   :  { %v1674_v48 = vpop.eup %1673 }
 0x321   :  { %v1676_v49 = vpop.eup %1675  ;;  %v1381_v51 = vmul.f32 %v1674_v48, %v1666_v38 }
 0x322   :  { %v1357_v52 = vmul.f32 %v1676_v49, %v1668_v40 }
 0x323   :  { %v1383_v53 = vadd.f32 %v1381_v51, %v1358_v50 }
 0x324   :  { %v1359_v36 = vadd.f32 %v1357_v52, %v1334_v22 }
 0x325   :  { %v1678_v54 = vpop.eup %1677  ;;  %1385 = vst [vmem:[%s1847_s5] sm:$0xff] %v1383_v53 }
 0x326   :  { %v1382_v55 = vmul.f32 %v1678_v54, %v1670_v41 }
 0x328   :  { %v1384_v56 = vadd.f32 %v1382_v55, %v1359_v36 }
 0x32a   :  { %1386 = vst [vmem:[%s1847_s5 + $0x8] sm:$0xff] %v1384_v56 }
 0x32b   :  { %1391 = vsyncpa [#allocation4], 1 }
 0x32c   :  { %1392 = vsyncpa [#allocation6], 1 }

</bundles_post_ra>
